<compile_context>
chip_gen: v6e
topology: v6e:2x2x1
jax: 0.10.0
libtpu: 0.0.40
codegen_flags: <defaults>
</compile_context>

<pallas_src>
import jax
import jax.numpy as jnp
from jax.experimental import pallas as pl
from jax.experimental.pallas import tpu as pltpu


def _round_up(n, m):
    return ((n + m - 1) // m) * m


def fcnet_kernel(x_ref, w1_ref, b1_ref, w2_ref, b2_ref, o_ref):
    # Layer 1: MXU matmul, f32 accumulate.
    h = jnp.dot(x_ref[...], w1_ref[...], preferred_element_type=jnp.float32)
    # Bias + ReLU epilogue in f32 on the VPU (b1 is (1, Hp) -> broadcasts over rows).
    h = jnp.maximum(h + b1_ref[...], 0.0)
    # Layer 2: cast activations to the MXU operand dtype, f32 accumulate.
    # (Padded hidden columns are exactly 0 after ReLU, so they contribute nothing.)
    y = jnp.dot(h.astype(w2_ref.dtype), w2_ref[...],
                preferred_element_type=jnp.float32)
    o_ref[...] = (y + b2_ref[...]).astype(o_ref.dtype)


def fcnet_forward(x, w1, b1, w2, b2, *, block_m=1024, matmul_dtype=jnp.bfloat16):
    """x: (B, D_in) f32. w1: (D_in, H). b1: (H,). w2: (H, D_out). b2: (D_out,).
    Returns flattened (B * D_out,) f32, matching output.view(-1) in PyTorch."""
    B, D_in = x.shape
    H = w1.shape[1]
    D_out = w2.shape[1]

    lane = 128
    # bf16 packs 16 rows per vreg (f32 packs 8) -> sublane multiple for the batch tile.
    sub = 16 if matmul_dtype == jnp.bfloat16 else 8

    Hp = _round_up(H, lane)           # lane-dense hidden
    Dp = _round_up(D_out, lane)       # lane-dense output (unmasked stores)
    tm = _round_up(min(block_m, _round_up(B, sub)), sub)   # rows per grid step
    Bp = _round_up(B, tm)             # padded batch, divisible by tm

    # Zero-padded, matmul-dtype operands; biases stay f32 (epilogue dtype).
    x_cast = x.astype(matmul_dtype)
    if Bp == B:
        x_p = x_cast
    else:
        x_p = jnp.zeros((Bp, D_in), matmul_dtype).at[:B, :].set(x_cast)
    w1_p = jnp.zeros((D_in, Hp), matmul_dtype).at[:, :H].set(w1.astype(matmul_dtype))
    w2_p = jnp.zeros((Hp, Dp), matmul_dtype).at[:H, :D_out].set(w2.astype(matmul_dtype))
    b1_p = jnp.zeros((1, Hp), jnp.float32).at[0, :H].set(b1.astype(jnp.float32))
    b2_p = jnp.zeros((1, Dp), jnp.float32).at[0, :D_out].set(b2.astype(jnp.float32))

    grid = (Bp // tm,)

    out = pl.pallas_call(
        fcnet_kernel,
        out_shape=jax.ShapeDtypeStruct((Bp, Dp), jnp.float32),
        grid=grid,
        in_specs=[
            pl.BlockSpec((tm, D_in), lambda i: (i, 0)),    # x tile streams over batch
            pl.BlockSpec((D_in, Hp), lambda i: (0, 0)),    # w1 resident in VMEM
            pl.BlockSpec((1, Hp), lambda i: (0, 0)),       # b1 resident
            pl.BlockSpec((Hp, Dp), lambda i: (0, 0)),      # w2 resident
            pl.BlockSpec((1, Dp), lambda i: (0, 0)),       # b2 resident
        ],
        out_specs=pl.BlockSpec((tm, Dp), lambda i: (i, 0)),
        # Batch axis is fully independent -> "parallel" (sharded across the 2 TCs
        # on v7x).  Resident weights are tiny, so the default scoped VMEM limit
        # is plenty even with v7x's 64 MiB of VMEM.
        compiler_params=pltpu.CompilerParams(
            dimension_semantics=("parallel",)),
    )(x_p, w1_p, b1_p, w2_p, b2_p)

    # Slice off padding, then flatten: output.view(-1).
    return out[:B, :D_out].reshape(-1)


def init_params(key, input_size, output_size, hidden=5):
    # Deterministic init mimicking nn.Linear's uniform(-1/sqrt(fan_in), 1/sqrt(fan_in)).
    k1, k2, k3, k4 = jax.random.split(key, 4)
    lim1 = 1.0 / jnp.sqrt(jnp.float32(input_size))
    lim2 = 1.0 / jnp.sqrt(jnp.float32(hidden))
    # PyTorch stores weight as (out, in); we pre-transpose to (in, out) for the kernel.
    w1 = jax.random.uniform(k1, (input_size, hidden), jnp.float32, -lim1, lim1)
    b1 = jax.random.uniform(k2, (hidden,), jnp.float32, -lim1, lim1)
    w2 = jax.random.uniform(k3, (hidden, output_size), jnp.float32, -lim2, lim2)
    b2 = jax.random.uniform(k4, (output_size,), jnp.float32, -lim2, lim2)
    return w1, b1, w2, b2


if __name__ == "__main__":
    key = jax.random.PRNGKey(0)
    kx, kp = jax.random.split(key)

    batch, input_size, output_size = 2, 16, 3
    x = jax.random.normal(kx, (batch, input_size), jnp.float32)
    w1, b1, w2, b2 = init_params(kp, input_size, output_size)

    out = fcnet_forward(x, w1, b1, w2, b2)
    out = jax.block_until_ready(out)

    # Pure-JAX reference with the same bf16 operand rounding / f32 accumulation.
    xb, w1b, w2b = (a.astype(jnp.bfloat16) for a in (x, w1, w2))
    h_ref = jnp.maximum(
        jnp.dot(xb, w1b, preferred_element_type=jnp.float32) + b1, 0.0)
    ref = jnp.dot(h_ref.astype(jnp.bfloat16), w2b,
                  preferred_element_type=jnp.float32) + b2
    ref = ref.reshape(-1)

    assert out.shape == (batch * output_size,)
    assert jnp.allclose(out, ref, atol=1e-4, rtol=1e-4), (out, ref)

    print("KERNEL_OK")
</pallas_src>

<mosaic_0001>
module attributes {stable_mosaic.version = 11 : i64} {
  func.func @fcnet_kernel(%arg0: i32, %arg1: memref<16x16xbf16, #tpu.memory_space<vmem>>, %arg2: memref<16x128xbf16, #tpu.memory_space<vmem>>, %arg3: memref<1x128xf32, #tpu.memory_space<vmem>>, %arg4: memref<128x128xbf16, #tpu.memory_space<vmem>>, %arg5: memref<1x128xf32, #tpu.memory_space<vmem>>, %arg6: memref<16x128xf32, #tpu.memory_space<vmem>>) attributes {dimension_semantics = [#tpu.dimension_semantics<parallel>], iteration_bounds = array<i64: 1>, scalar_prefetch = 0 : i64, scratch_operands = 0 : i64, tpu.core_type = #tpu.core_type<tc>, window_params = [{transform_indices = @transform_0, window_bounds = array<i64: 16, 16>}, {pipeline_mode = #tpu.pipeline_mode<synchronous>, transform_indices = @transform_1, window_bounds = array<i64: 16, 128>}, {pipeline_mode = #tpu.pipeline_mode<synchronous>, transform_indices = @transform_2, window_bounds = array<i64: 1, 128>}, {pipeline_mode = #tpu.pipeline_mode<synchronous>, transform_indices = @transform_3, window_bounds = array<i64: 128, 128>}, {pipeline_mode = #tpu.pipeline_mode<synchronous>, transform_indices = @transform_4, window_bounds = array<i64: 1, 128>}, {transform_indices = @transform_5, window_bounds = array<i64: 16, 128>}]} {
    %c0 = arith.constant 0 : index
    %c0_0 = arith.constant 0 : index
    %0 = vector.load %arg1[%c0, %c0_0] : memref<16x16xbf16, #tpu.memory_space<vmem>>, vector<16x16xbf16>
    %c0_1 = arith.constant 0 : index
    %c0_2 = arith.constant 0 : index
    %1 = vector.load %arg2[%c0_1, %c0_2] : memref<16x128xbf16, #tpu.memory_space<vmem>>, vector<16x128xbf16>
    %cst = arith.constant dense<0.000000e+00> : vector<16x128xf32>
    %2 = tpu.matmul %0, %1, %cst {dimension_numbers = #tpu.dot_dimension_numbers<[1], [0], [0], [1], [0, 0, 1, 1], [], []>} : vector<16x16xbf16>, vector<16x128xbf16>, vector<16x128xf32> -> vector<16x128xf32>
    %c0_3 = arith.constant 0 : index
    %c0_4 = arith.constant 0 : index
    %3 = vector.load %arg3[%c0_3, %c0_4] : memref<1x128xf32, #tpu.memory_space<vmem>>, vector<1x128xf32>
    %4 = vector.broadcast %3 : vector<1x128xf32> to vector<16x128xf32>
    %5 = arith.addf %2, %4 : vector<16x128xf32>
    %cst_5 = arith.constant 0.000000e+00 : f32
    %6 = vector.broadcast %cst_5 : f32 to vector<16x128xf32>
    %7 = arith.maximumf %5, %6 : vector<16x128xf32>
    %8 = arith.truncf %7 : vector<16x128xf32> to vector<16x128xbf16>
    %c0_6 = arith.constant 0 : index
    %c0_7 = arith.constant 0 : index
    %9 = vector.load %arg4[%c0_6, %c0_7] : memref<128x128xbf16, #tpu.memory_space<vmem>>, vector<128x128xbf16>
    %cst_8 = arith.constant dense<0.000000e+00> : vector<16x128xf32>
    %10 = tpu.matmul %8, %9, %cst_8 {dimension_numbers = #tpu.dot_dimension_numbers<[1], [0], [0], [1], [0, 0, 1, 1], [], []>} : vector<16x128xbf16>, vector<128x128xbf16>, vector<16x128xf32> -> vector<16x128xf32>
    %c0_9 = arith.constant 0 : index
    %c0_10 = arith.constant 0 : index
    %11 = vector.load %arg5[%c0_9, %c0_10] : memref<1x128xf32, #tpu.memory_space<vmem>>, vector<1x128xf32>
    %12 = vector.broadcast %11 : vector<1x128xf32> to vector<16x128xf32>
    %13 = arith.addf %10, %12 : vector<16x128xf32>
    %c0_11 = arith.constant 0 : index
    %c0_12 = arith.constant 0 : index
    %14 = vector.load %arg6[%c0_11, %c0_12] : memref<16x128xf32, #tpu.memory_space<vmem>>, vector<16x128xf32>
    tpu.vector_store %arg6[%c0_11, %c0_12], %13 {strides = array<i32>} : memref<16x128xf32, #tpu.memory_space<vmem>>, vector<16x128xf32>,
    return
  }
  func.func @transform_0(%arg0: i32) -> (i32, i32) {
    %c0_i32 = arith.constant 0 : i32
    %c0_i32_0 = arith.constant 0 : i32
    return %arg0, %c0_i32 : i32, i32
  }
  func.func @transform_1(%arg0: i32) -> (i32, i32) {
    %c0_i32 = arith.constant 0 : i32
    %c0_i32_0 = arith.constant 0 : i32
    %c0_i32_1 = arith.constant 0 : i32
    return %c0_i32, %c0_i32_0 : i32, i32
  }
  func.func @transform_2(%arg0: i32) -> (i32, i32) {
    %c0_i32 = arith.constant 0 : i32
    %c0_i32_0 = arith.constant 0 : i32
    %c0_i32_1 = arith.constant 0 : i32
    return %c0_i32, %c0_i32_0 : i32, i32
  }
  func.func @transform_3(%arg0: i32) -> (i32, i32) {
    %c0_i32 = arith.constant 0 : i32
    %c0_i32_0 = arith.constant 0 : i32
    %c0_i32_1 = arith.constant 0 : i32
    return %c0_i32, %c0_i32_0 : i32, i32
  }
  func.func @transform_4(%arg0: i32) -> (i32, i32) {
    %c0_i32 = arith.constant 0 : i32
    %c0_i32_0 = arith.constant 0 : i32
    %c0_i32_1 = arith.constant 0 : i32
    return %c0_i32, %c0_i32_0 : i32, i32
  }
  func.func @transform_5(%arg0: i32) -> (i32, i32) {
    %c0_i32 = arith.constant 0 : i32
    %c0_i32_0 = arith.constant 0 : i32
    return %arg0, %c0_i32 : i32, i32
  }
}

</mosaic_0001>

<bundles_post_ra>
// kernel: tpu_custom_call.1
= control target key start
LH: loop header
LB: loop body
LE: loop exit
PB: predicated region body
PF: predicated region fallthrough
CT: control target
= control target key end

     0   :  { %10 = vsyncpa [#allocation3], 0  ;;  %s479_s0 = inlined_call_operand.hbm [shape: bf16[16,16], index: 0, kind: input, shape index: {}]   ;;  %s480_s1 = inlined_call_operand.hbm [shape: bf16[16,128], index: 1, kind: input, shape index: {}]   ;;  %s481_s2 = inlined_call_operand.vmem [shape: f32[1,128], index: 2, kind: input, shape index: {}]   ;;  %s482_s3 = inlined_call_operand.hbm [shape: bf16[128,128], index: 3, kind: input, shape index: {}]   ;;  %s483_s4 = inlined_call_operand.vmem [shape: f32[1,128], index: 4, kind: input, shape index: {}]   ;;  %s484_s5 = inlined_call_operand.hbm [shape: f32[16,128], index: 5, kind: output, shape index: {}]  }
   0x1   :  { %11 = vsyncpa [#allocation6], 0 }
   0x2   :  { %12 = vsyncpa [#allocation4], 0  ;;  %s421_s18 = smov [#allocation5]   ;;  %s422_s20 = smov [#allocation2]  }
   0x3   :  { %s30_s19 = sshll.u32 %s421_s18, 4  ;;  %s18_s21 = sshll.u32 %s422_s20, 4  ;;  %s31_s19 = int_to_ptr.vmem [resolvable:$true] %s30_s19  ;;  %s19_s21 = int_to_ptr.vmem [resolvable:$true] %s18_s21 }
   0x4   :  { %s343_s22 = scalar_lea.vmem %s31_s19, 128  ;;  %p348_p1 = scmp.lt.s32.totalorder %s31_s19, %s31_s19 }
   0x5   :  { %p344_p0 = scmp.ne.s32.totalorder %s31_s19, %s343_s22  ;;  %p349_p2 = scmp.lt.s32.totalorder %s343_s22, %s343_s22 }
   0x7   :  { %p350_p3 = por %p349_p2, %p348_p1 }
   0x9   :  { %p351_p4 = pnand %p350_p3, %p344_p0 }
   0xb   :  { %354 = shalt.err (!%p351_p4)
}
   0xc   :  { %s423_s23 = smov 64   ;;  %s424_s24 = smov 4  }
   0xd   :  { %36 = dma.hbm_to_vmem [thread:$0]  %s480_s1, 128, %s31_s19, [#allocation6], %s423_s23, %s423_s23, %s424_s24  }
   0xe   :  { %s363_s27 = scalar_lea.vmem %s19_s21, 128  ;;  %p368_p6 = scmp.lt.s32.totalorder %s19_s21, %s19_s21 }
   0xf   :  { %p364_p5 = scmp.ne.s32.totalorder %s19_s21, %s363_s27  ;;  %p369_p7 = scmp.lt.s32.totalorder %s363_s27, %s363_s27 }
  0x11   :  { %p370_p8 = por %p369_p7, %p368_p6 }
  0x13   :  { %p371_p9 = pnand %p370_p8, %p364_p5 }
  0x15   :  { %374 = shalt.err (!%p371_p9)
}
  0x16   :  { %24 = dma.hbm_to_vmem [thread:$0]  %s479_s0, 128, %s19_s21, [#allocation3], %s423_s23, %s423_s23, %s424_s24  }
  0x17   :  { %s425_s30 = smov [#allocation7]  }
  0x18   :  { %s44_s6 = sshll.u32 %s425_s30, 4  ;;  %s45_s6 = int_to_ptr.vmem [resolvable:$true] %s44_s6 }
  0x19   :  { %s383_s7 = scalar_lea.vmem %s45_s6, 1024  ;;  %p388_p11 = scmp.lt.s32.totalorder %s45_s6, %s45_s6 }
  0x1a   :  { %p384_p10 = scmp.ne.s32.totalorder %s45_s6, %s383_s7  ;;  %p389_p12 = scmp.lt.s32.totalorder %s383_s7, %s383_s7 }
  0x1c   :  { %p390_p13 = por %p389_p12, %p388_p11 }
  0x1e   :  { %p391_p0 = pnand %p390_p13, %p384_p10 }
  0x20   :  { %394 = shalt.err (!%p391_p0)
}
  0x21   :  { %50 = dma.hbm_to_vmem [thread:$0]  %s482_s3, 1024, %s45_s6, [#allocation6], %s423_s23, %s423_s23, %s424_s24  }
  0x22   :  { %415 = dma.done.wait [#allocation3], 128  }
  0x23   :  { %416 = vsyncadd [#allocation3], 4294967168 }
  0x24   :  { %417 = dma.done.wait [#allocation6], 1152  }
  0x25   :  { %418 = vsyncadd [#allocation6], 4294966144  ;;  %v426_v0 = vmov 0.0   ;;  %vm427_vm0 = vmmov 0   ;;  %v325_v1 = vld [vmem:[#allocation5] sm:$0xff]   ;;  %v326_v2 = vld [vmem:[#allocation2] sm:$0xff]  }
  0x26   :  { %289 = vmatprep.subr.bf16.mxu0 %v426_v0  ;;  %291 = vmatprep.mubr.msk.bf16.mxu0 %vm427_vm0, %v426_v0  ;;  %vm85_vm1 = vcmask 130048   ;;  %v327_v3 = vld [vmem:[#allocation7 + $0x38] sm:$0xff]   ;;  %v328_v4 = vld [vmem:[#allocation7 + $0x30] sm:$0xff]   ;;  %v329_v5 = vld [vmem:[#allocation7 + $0x28] sm:$0xff]   ;;  %s428_s11 = smov [#allocation8]  }
  0x27   :  { %295 = vmatprep.subr.bf16.mxu1 %v426_v0  ;;  %311 = vmatprep.mubr.msk.bf16.mxu1 %vm427_vm0, %v426_v0  ;;  %v330_v6 = vld [vmem:[#allocation7 + $0x20] sm:$0xff]   ;;  %v331_v7 = vld [vmem:[#allocation7 + $0x18] sm:$0xff]   ;;  %v332_v8 = vld [vmem:[#allocation7 + $0x10] sm:$0xff]   ;;  %s252_s12 = sshll.u32 %s428_s11, 4  ;;  %s253_s12 = int_to_ptr.vmem [resolvable:$true] %s252_s12 }
  0x28   :  { %290 = vmatpush3.bf16.msra.mxu0 %v325_v1  ;;  %296 = vmatpush3.bf16.msra.mxu1 %v327_v3  ;;  %v333_v9 = vld [vmem:[#allocation7 + $0x8] sm:$0xff]   ;;  %v334_v10 = vld [vmem:[#allocation7] sm:$0xff]   ;;  %v265_v11 = vld [vmem:[%s481_s2] ss:$0 sm:$0xff]  ;;  %s395_s2 = scalar_lea.vmem %s253_s12, 256  ;;  %p400_p2 = scmp.lt.s32.totalorder %s253_s12, %s253_s12 }
  0x29   :  { %297 = vmatprep.subr.bf16.mxu1 %v426_v0  ;;  %v269_v21 = vld [vmem:[%s483_s4] ss:$0 sm:$0xff]  ;;  %p396_p1 = scmp.ne.s32.totalorder %s253_s12, %s395_s2  ;;  %p401_p3 = scmp.lt.s32.totalorder %s395_s2, %s395_s2 }
  0x2b   :  { %292 = vmatmul.mubr.msk.bf16.vlgmr.msra.gmra.mxu0 %vm85_vm1, %v326_v2  ;;  %p402_p4 = por %p401_p3, %p400_p2 }
  0x2c   :  { %298 = vmatpush3.bf16.msra.mxu1 %v328_v4 }
  0x2d   :  { %299 = vmatprep.subr.bf16.mxu1 %v426_v0  ;;  %p403_p5 = pnand %p402_p4, %p396_p1 }
  0x30   :  { %300 = vmatpush3.bf16.msra.mxu1 %v329_v5 }
  0x31   :  { %301 = vmatprep.subr.bf16.mxu1 %v426_v0 }
  0x34   :  { %302 = vmatpush3.bf16.msra.mxu1 %v330_v6 }
  0x35   :  { %303 = vmatprep.subr.bf16.mxu1 %v426_v0 }
  0x38   :  { %304 = vmatpush3.bf16.msra.mxu1 %v331_v7 }
  0x39   :  { %305 = vmatprep.subr.bf16.mxu1 %v426_v0 }
  0x3c   :  { %306 = vmatpush3.bf16.msra.mxu1 %v332_v8 }
  0x3d   :  { %307 = vmatprep.subr.bf16.mxu1 %v426_v0 }
  0x40   :  { %308 = vmatpush3.bf16.msra.mxu1 %v333_v9 }
  0x41   :  { %309 = vmatprep.subr.bf16.mxu1 %v426_v0 }
  0x44   :  { %310 = vmatpush3.bf16.msra.mxu1 %v334_v10 }
  0xeb   :  { %v123_v12 = vpop.f32.mrf.mxu0 }
  0xec   :  { %v124_v14 = vadd.f32 %v265_v11, %v123_v12 }
  0xed   :  { %v293_v13 = vpop.f32.mrf.mxu0 }
  0xee   :  { %v130_v18 = vmax.f32 %v124_v14, 0.0 }
  0xef   :  { %v126_v15 = vpop.f32.mrf.mxu0 }
  0xf0   :  { %v127_v16 = vadd.f32 %v265_v11, %v126_v15 }
  0xf1   :  { %v294_v17 = vpop.f32.mrf.mxu0 }
  0xf2   :  { %v131_v19 = vmax.f32 %v127_v16, 0.0 }
  0xf4   :  { %v132_v20 = vpack.c.bf16 %v131_v19, %v130_v18 }
  0xf6   :  { %312 = vmatmul.mubr.bf16.vlgmr.msra.gmra.mxu1 %v132_v20 }
 0x1b6   :  { %v238_v22 = vpop.f32.mrf.mxu1 }
 0x1b7   :  { %v239_v23 = vadd.f32 %v269_v21, %v238_v22 }
 0x1b8   :  { %v313_v24 = vpop.f32.mrf.mxu1 }
 0x1b9   :  { %245 = vst [vmem:[#allocation8] sm:$0xff] %v239_v23 }
 0x1ba   :  { %v241_v25 = vpop.f32.mrf.mxu1 }
 0x1bb   :  { %v242_v26 = vadd.f32 %v269_v21, %v241_v25 }
 0x1bc   :  { %v314_v27 = vpop.f32.mrf.mxu1 }
 0x1bd   :  { %246 = vst [vmem:[#allocation8 + $0x8] sm:$0xff] %v242_v26 }
 0x1be   :  { %406 = shalt.err (!%p403_p5)
}
 0x1bf   :  { %s429_s13 = smov 128   ;;  %s430_s4 = smov 8  }
 0x1c0   :  { %258 = dma.vmem_to_hbm [thread:$0]  %s253_s12, 256, %s484_s5, [#allocation4], %s429_s13, %s429_s13, %s430_s4  }
 0x1c1   :  { %419 = dma.done.wait [#allocation4], 256  }
 0x1c2   :  { %420 = vsyncadd [#allocation4], 4294967040 }
 0x1c3   :  { %262 = vsyncpa [#allocation3], 1 }
 0x1c4   :  { %263 = vsyncpa [#allocation6], 1 }
 0x1c5   :  { %264 = vsyncpa [#allocation4], 1 }

</bundles_post_ra>
